<compile_context>
chip_gen: v5e
topology: v5e:2x2
jax: 0.10.0
libtpu: 0.0.40
codegen_flags: <defaults>
</compile_context>

<pallas_src>
import functools

import jax
import jax.numpy as jnp
from jax.experimental import pallas as pl
from jax.experimental.pallas import tpu as pltpu

_VMEM_LIMIT = 32 * 1024 * 1024  # >= default scoped limit on v6e/v7x, raises v5e's 16 MiB


def _pool_bn_relu(xw_ref, gamma, beta, *, eps, inv_window, inv_l):
    """Adaptive-avg-pool (windows on axis 0) + training-mode BN + ReLU, f32 math."""
    pooled = xw_ref[0].astype(jnp.float32)
    for w in range(1, xw_ref.shape[0]):          # window count is small & static
        pooled = pooled + xw_ref[w].astype(jnp.float32)
    pooled = pooled * inv_window                 # (C_tile, L)
    # Fused one-pass batch statistics per channel row (single lane-axis reduce pass).
    s1 = jnp.sum(pooled, axis=-1, keepdims=True)
    s2 = jnp.sum(pooled * pooled, axis=-1, keepdims=True)
    mean = s1 * inv_l
    var = s2 * inv_l - mean * mean               # biased variance, E[x^2] - E[x]^2
    xhat = (pooled - mean) * jax.lax.rsqrt(var + eps)
    return jnp.maximum(xhat * gamma + beta, 0.0)


def _tiled_kernel(xw_ref, y_ref, g_ref, b_ref, o_ref, *,
                  eps, inv_window, inv_l, tc, cout, mask_y):
    # xw_ref: (win, TC, L)  y_ref: (TC, L)  g/b: (TC, 1)  o_ref: (TC, L)
    xbn = _pool_bn_relu(xw_ref, g_ref[...], b_ref[...],
                        eps=eps, inv_window=inv_window, inv_l=inv_l)
    yv = y_ref[...].astype(jnp.float32)
    if mask_y:  # cin > cout: only the first cout output channels receive y
        ch = pl.program_id(0) * tc + jax.lax.broadcasted_iota(jnp.int32, (tc, 1), 0)
        yv = jnp.where(ch < cout, yv, 0.0)
    o_ref[...] = (xbn + yv).astype(o_ref.dtype)


def _small_kernel(xw_ref, y_ref, g_ref, b_ref, o_ref, *,
                  eps, inv_window, inv_l, cin, cout):
    # Whole problem resident: xw (win, Cin, L), y (Cout, L), out (Cmax, L).
    xbn = _pool_bn_relu(xw_ref, g_ref[...], b_ref[...],
                        eps=eps, inv_window=inv_window, inv_l=inv_l)
    yv = y_ref[...].astype(jnp.float32)
    if cin == cout:
        o_ref[...] = (xbn + yv).astype(o_ref.dtype)
    elif cin > cout:
        o_ref[:cout, :] = (xbn[:cout, :] + yv).astype(o_ref.dtype)
        o_ref[cout:, :] = xbn[cout:, :].astype(o_ref.dtype)
    else:
        o_ref[:cin, :] = (xbn + yv[:cin, :]).astype(o_ref.dtype)
        o_ref[cin:, :] = yv[cin:, :].astype(o_ref.dtype)


def _pick_channel_tile(cin, window, l, max_tc, budget=16 * 1024 * 1024):
    """Largest channel tile whose double-buffered f32 working set fits the budget."""
    def fits(t):
        # 2x (xw tile + y tile) + 2x out tile, f32, with headroom for spilled temps.
        return 4 * t * l * (2 * window + 4) <= budget
    cands = [t for t in (256, 128, 64, 32, 16, 8)
             if t <= min(cin, max_tc) and cin % t == 0]
    if cin <= max_tc:
        cands.append(cin)
    cands = sorted(set(cands), reverse=True)
    for t in cands:
        if fits(t):
            return t
    # TODO(synk): very large N*Ho*Wo would need a two-pass (accumulated) BN; fall
    # back to the smallest valid tile here.
    return cands[-1]


def shortcut_a(x, y, gamma, beta, *, eps=1e-5, channel_tile=None):
    """Pallas implementation of ShortCutA.forward(x, y).  NCHW in, NCHW out."""
    n, cin, hx, wx = x.shape
    ny, cout, ho, wo = y.shape
    assert n == ny
    # TODO(synk): general (non-divisible) adaptive_avg_pool2d windows are not
    # implemented; this covers the ResNet case (integer-stride downsampling).
    assert hx % ho == 0 and wx % wo == 0
    sh, sw = hx // ho, wx // wo
    win = sh * sw
    l = n * ho * wo
    cmax = max(cin, cout)

    dt = jnp.result_type(x.dtype, y.dtype)
    isz = jnp.dtype(dt).itemsize

    # Single layout copy: unfold pooling windows AND go lane-dense in one transpose
    # -> (window, Cin, N*Ho*Wo), with N*Ho*Wo on the 128-lane axis.
    xw = x.reshape(n, cin, ho, sh, wo, sw).transpose(3, 5, 1, 0, 2, 4)
    xw = xw.reshape(win, cin, l).astype(dt)
    # y lane-dense: (Cout, N*Ho*Wo) with the same lane ordering as xw's last axis.
    y2 = jnp.transpose(y, (1, 0, 2, 3)).reshape(cout, l).astype(dt)

    g = gamma.reshape(cin, 1).astype(jnp.float32)
    b = beta.reshape(cin, 1).astype(jnp.float32)

    inv_window = 1.0 / win
    inv_l = 1.0 / l

    cost = pl.CostEstimate(
        flops=int(win * cin * l + 10 * cin * l + cmax * l),
        transcendentals=int(cin),
        bytes_accessed=int((win * cin * l + min(cin, cout) * l + cmax * l) * isz),
    )
    cparams = pltpu.CompilerParams(
        dimension_semantics=("parallel",),
        vmem_limit_bytes=_VMEM_LIMIT,
    )

    alias_y = cin <= cout                      # output = y buffer; only first cin rows written
    use_tiled = (cin % 8 == 0) and (alias_y or cout >= 8)

    if use_tiled:
        max_tc = cin if alias_y else cout
        if channel_tile is None:
            tc = _pick_channel_tile(cin, win, l, max_tc)
        else:
            tc = int(channel_tile)
            assert cin % tc == 0 and (tc % 8 == 0 or tc == cin) and tc <= max_tc
        grid = (cin // tc,)

        if alias_y:
            y_map = lambda c: (c, 0)
        else:
            last_y_blk = (cout + tc - 1) // tc - 1
            y_map = lambda c: (jnp.minimum(c, last_y_blk), 0)

        kernel = functools.partial(
            _tiled_kernel, eps=eps, inv_window=inv_window, inv_l=inv_l,
            tc=tc, cout=cout, mask_y=not alias_y)

        out2 = pl.pallas_call(
            kernel,
            out_shape=jax.ShapeDtypeStruct((cmax, l), dt),
            grid=grid,
            in_specs=[
                pl.BlockSpec((win, tc, l), lambda c: (0, c, 0)),
                pl.BlockSpec((tc, l), y_map),
                pl.BlockSpec((tc, 1), lambda c: (c, 0)),
                pl.BlockSpec((tc, 1), lambda c: (c, 0)),
            ],
            out_specs=pl.BlockSpec((tc, l), lambda c: (c, 0)),
            input_output_aliases=({1: 0} if alias_y else {}),
            compiler_params=cparams,
            cost_estimate=cost,
        )(xw, y2, g, b)
    else:
        # Tiny / 8-unaligned channel counts: single program, whole arrays resident.
        kernel = functools.partial(
            _small_kernel, eps=eps, inv_window=inv_window, inv_l=inv_l,
            cin=cin, cout=cout)
        out2 = pl.pallas_call(
            kernel,
            out_shape=jax.ShapeDtypeStruct((cmax, l), dt),
            grid=(1,),
            in_specs=[
                pl.BlockSpec((win, cin, l), lambda i: (0, 0, 0)),
                pl.BlockSpec((cout, l), lambda i: (0, 0)),
                pl.BlockSpec((cin, 1), lambda i: (0, 0)),
                pl.BlockSpec((cin, 1), lambda i: (0, 0)),
            ],
            out_specs=pl.BlockSpec((cmax, l), lambda i: (0, 0)),
            compiler_params=pltpu.CompilerParams(
                dimension_semantics=("arbitrary",),
                vmem_limit_bytes=_VMEM_LIMIT,
            ),
            cost_estimate=cost,
        )(xw, y2, g, b)

    return jnp.transpose(out2.reshape(cmax, n, ho, wo), (1, 0, 2, 3))


def ref_shortcut_a(x, y, gamma, beta, eps=1e-5):
    """Pure-JAX reference mirroring the PyTorch forward."""
    n, cin, hx, wx = x.shape
    _, cout, ho, wo = y.shape
    sh, sw = hx // ho, wx // wo
    pooled = x.reshape(n, cin, ho, sh, wo, sw).mean(axis=(3, 5))
    mean = pooled.mean(axis=(0, 2, 3), keepdims=True)
    var = ((pooled - mean) ** 2).mean(axis=(0, 2, 3), keepdims=True)
    xbn = (pooled - mean) / jnp.sqrt(var + eps)
    xbn = jnp.maximum(
        xbn * gamma.reshape(1, -1, 1, 1) + beta.reshape(1, -1, 1, 1), 0.0
    )
    if cin == cout:
        return xbn + y
    elif cin > cout:
        return xbn.at[:, :cout].add(y)
    else:
        return y.at[:, :cin].add(xbn)


if __name__ == "__main__":
    key = jax.random.PRNGKey(0)

    def check(case_key, n, cin, cout, stride, ho, wo, channel_tile=None):
        kx, ky, kg, kb = jax.random.split(case_key, 4)
        x = jax.random.normal(kx, (n, cin, ho * stride, wo * stride), jnp.float32)
        y = jax.random.normal(ky, (n, cout, ho, wo), jnp.float32)
        gamma = 1.0 + 0.1 * jax.random.normal(kg, (cin,), jnp.float32)
        beta = 0.1 * jax.random.normal(kb, (cin,), jnp.float32)

        fn = jax.jit(functools.partial(shortcut_a, channel_tile=channel_tile))
        out = jax.block_until_ready(fn(x, y, gamma, beta))
        ref = ref_shortcut_a(x, y, gamma, beta)
        assert out.shape == ref.shape == (n, max(cin, cout), ho, wo)
        err = float(jnp.max(jnp.abs(out - ref)))
        assert jnp.allclose(out, ref, rtol=1e-5, atol=1e-4), err

    k1, k2, k3 = jax.random.split(key, 3)
    # cin < cout (common ResNet case): tiled "parallel" grid, output aliased onto y.
    check(k1, n=2, cin=16, cout=32, stride=2, ho=8, wo=8, channel_tile=8)
    # cin > cout: tiled grid with clamped y blocks + masked residual add.
    check(k2, n=2, cin=32, cout=16, stride=2, ho=8, wo=8, channel_tile=8)
    # tiny / 8-unaligned channel count: single-program fallback path.
    check(k3, n=2, cin=4, cout=8, stride=2, ho=8, wo=8)

    print("KERNEL_OK")
</pallas_src>

<mosaic_0001>
module attributes {stable_mosaic.version = 11 : i64} {
  func.func @_tiled_kernel(%arg0: i32, %arg1: memref<4x8x128xf32, #tpu.memory_space<vmem>>, %arg2: memref<8x128xf32, #tpu.memory_space<vmem>>, %arg3: memref<8x1xf32, #tpu.memory_space<vmem>>, %arg4: memref<8x1xf32, #tpu.memory_space<vmem>>, %arg5: memref<8x128xf32, #tpu.memory_space<vmem>>) attributes {dimension_semantics = [#tpu.dimension_semantics<parallel>], iteration_bounds = array<i64: 2>, scalar_prefetch = 0 : i64, scratch_operands = 0 : i64, tpu.core_type = #tpu.core_type<tc>, window_params = [{transform_indices = @transform_0, window_bounds = array<i64: 4, 8, 128>}, {transform_indices = @transform_1, window_bounds = array<i64: 8, 128>}, {transform_indices = @transform_2, window_bounds = array<i64: 8, 1>}, {transform_indices = @transform_3, window_bounds = array<i64: 8, 1>}, {transform_indices = @transform_4, window_bounds = array<i64: 8, 128>}]} {
    %c0 = arith.constant 0 : index
    %c0_0 = arith.constant 0 : index
    %0 = vector.load %arg3[%c0, %c0_0] : memref<8x1xf32, #tpu.memory_space<vmem>>, vector<8x1xf32>
    %c0_1 = arith.constant 0 : index
    %c0_2 = arith.constant 0 : index
    %1 = vector.load %arg4[%c0_1, %c0_2] : memref<8x1xf32, #tpu.memory_space<vmem>>, vector<8x1xf32>
    %c0_3 = arith.constant 0 : index
    %c0_4 = arith.constant 0 : index
    %c0_5 = arith.constant 0 : index
    %2 = vector.load %arg1[%c0_3, %c0_4, %c0_5] : memref<4x8x128xf32, #tpu.memory_space<vmem>>, vector<1x8x128xf32>
    %3 = vector.shape_cast %2 : vector<1x8x128xf32> to vector<8x128xf32>
    %c1 = arith.constant 1 : index
    %c0_6 = arith.constant 0 : index
    %c0_7 = arith.constant 0 : index
    %4 = vector.load %arg1[%c1, %c0_6, %c0_7] : memref<4x8x128xf32, #tpu.memory_space<vmem>>, vector<1x8x128xf32>
    %5 = vector.shape_cast %4 : vector<1x8x128xf32> to vector<8x128xf32>
    %6 = arith.addf %3, %5 : vector<8x128xf32>
    %c2 = arith.constant 2 : index
    %c0_8 = arith.constant 0 : index
    %c0_9 = arith.constant 0 : index
    %7 = vector.load %arg1[%c2, %c0_8, %c0_9] : memref<4x8x128xf32, #tpu.memory_space<vmem>>, vector<1x8x128xf32>
    %8 = vector.shape_cast %7 : vector<1x8x128xf32> to vector<8x128xf32>
    %9 = arith.addf %6, %8 : vector<8x128xf32>
    %c3 = arith.constant 3 : index
    %c0_10 = arith.constant 0 : index
    %c0_11 = arith.constant 0 : index
    %10 = vector.load %arg1[%c3, %c0_10, %c0_11] : memref<4x8x128xf32, #tpu.memory_space<vmem>>, vector<1x8x128xf32>
    %11 = vector.shape_cast %10 : vector<1x8x128xf32> to vector<8x128xf32>
    %12 = arith.addf %9, %11 : vector<8x128xf32>
    %cst = arith.constant 2.500000e-01 : f32
    %13 = vector.broadcast %cst : f32 to vector<8x128xf32>
    %14 = arith.mulf %12, %13 : vector<8x128xf32>
    %cst_12 = arith.constant dense<0.000000e+00> : vector<8xf32>
    %15 = vector.multi_reduction <add>, %14, %cst_12 [1] : vector<8x128xf32> to vector<8xf32>
    %16 = vector.shape_cast %15 : vector<8xf32> to vector<8x1xf32>
    %17 = arith.mulf %14, %14 : vector<8x128xf32>
    %cst_13 = arith.constant dense<0.000000e+00> : vector<8xf32>
    %18 = vector.multi_reduction <add>, %17, %cst_13 [1] : vector<8x128xf32> to vector<8xf32>
    %19 = vector.shape_cast %18 : vector<8xf32> to vector<8x1xf32>
    %cst_14 = arith.constant 7.812500e-03 : f32
    %20 = vector.broadcast %cst_14 : f32 to vector<8x1xf32>
    %21 = arith.mulf %16, %20 : vector<8x1xf32>
    %cst_15 = arith.constant 7.812500e-03 : f32
    %22 = vector.broadcast %cst_15 : f32 to vector<8x1xf32>
    %23 = arith.mulf %19, %22 : vector<8x1xf32>
    %24 = arith.mulf %21, %21 : vector<8x1xf32>
    %25 = arith.subf %23, %24 : vector<8x1xf32>
    %26 = vector.broadcast %21 : vector<8x1xf32> to vector<8x128xf32>
    %27 = arith.subf %14, %26 : vector<8x128xf32>
    %cst_16 = arith.constant 9.99999974E-6 : f32
    %28 = vector.broadcast %cst_16 : f32 to vector<8x1xf32>
    %29 = arith.addf %25, %28 : vector<8x1xf32>
    %30 = math.rsqrt %29 : vector<8x1xf32>
    %31 = vector.broadcast %30 : vector<8x1xf32> to vector<8x128xf32>
    %32 = arith.mulf %27, %31 : vector<8x128xf32>
    %33 = vector.broadcast %0 : vector<8x1xf32> to vector<8x128xf32>
    %34 = arith.mulf %32, %33 : vector<8x128xf32>
    %35 = vector.broadcast %1 : vector<8x1xf32> to vector<8x128xf32>
    %36 = arith.addf %34, %35 : vector<8x128xf32>
    %cst_17 = arith.constant 0.000000e+00 : f32
    %37 = vector.broadcast %cst_17 : f32 to vector<8x128xf32>
    %38 = arith.maximumf %36, %37 : vector<8x128xf32>
    %c0_18 = arith.constant 0 : index
    %c0_19 = arith.constant 0 : index
    %39 = vector.load %arg2[%c0_18, %c0_19] : memref<8x128xf32, #tpu.memory_space<vmem>>, vector<8x128xf32>
    %40 = arith.addf %38, %39 : vector<8x128xf32>
    %c0_20 = arith.constant 0 : index
    %c0_21 = arith.constant 0 : index
    %41 = vector.load %arg5[%c0_20, %c0_21] : memref<8x128xf32, #tpu.memory_space<vmem>>, vector<8x128xf32>
    tpu.vector_store %arg5[%c0_20, %c0_21], %40 {strides = array<i32>} : memref<8x128xf32, #tpu.memory_space<vmem>>, vector<8x128xf32>,
    return
  }
  func.func @transform_0(%arg0: i32) -> (i32, i32, i32) {
    %c0_i32 = arith.constant 0 : i32
    %c0_i32_0 = arith.constant 0 : i32
    %c0_i32_1 = arith.constant 0 : i32
    return %c0_i32, %arg0, %c0_i32_0 : i32, i32, i32
  }
  func.func @transform_1(%arg0: i32) -> (i32, i32) {
    %c0_i32 = arith.constant 0 : i32
    %c0_i32_0 = arith.constant 0 : i32
    return %arg0, %c0_i32 : i32, i32
  }
  func.func @transform_2(%arg0: i32) -> (i32, i32) {
    %c0_i32 = arith.constant 0 : i32
    %c0_i32_0 = arith.constant 0 : i32
    return %arg0, %c0_i32 : i32, i32
  }
  func.func @transform_3(%arg0: i32) -> (i32, i32) {
    %c0_i32 = arith.constant 0 : i32
    %c0_i32_0 = arith.constant 0 : i32
    return %arg0, %c0_i32 : i32, i32
  }
  func.func @transform_4(%arg0: i32) -> (i32, i32) {
    %c0_i32 = arith.constant 0 : i32
    %c0_i32_0 = arith.constant 0 : i32
    return %arg0, %c0_i32 : i32, i32
  }
}

</mosaic_0001>

<bundles_post_ra>
// kernel: shortcut_a.1
= control target key start
LH: loop header
LB: loop body
LE: loop exit
PB: predicated region body
PF: predicated region fallthrough
CT: control target
= control target key end

     0   :  { %s536_s15 = smov 0   ;;  %s538_s16 = smov 0   ;;  %s601_s0 = inlined_call_operand.vmem [shape: f32[4,16,128], index: 0, kind: input, shape index: {}]   ;;  %s602_s1 = inlined_call_operand.vmem [shape: f32[32,128], index: 1, kind: input, shape index: {}, may-alias: {1,4}]   ;;  %s603_s2 = inlined_call_operand.vmem [shape: f32[16,1], index: 2, kind: input, shape index: {}]   ;;  %s604_s3 = inlined_call_operand.vmem [shape: f32[16,1], index: 3, kind: input, shape index: {}]   ;;  %s605_s4 = inlined_call_operand.vmem [shape: f32[32,128], index: 4, kind: output, shape index: {}, may-alias: {1,4}]  }
   0x1   :  { %s540_s17 = smov 0  }
   0x2 LB: > { %s552_s18 = sadd.s32 4294967295, %s508_s17   ;;  %s555_s19 = sadd.s32 1, %s508_s17   ;;  %s508_s17 = sphi %s540_s17, %s608_s17   ;;  %s504_s16 = sphi %s538_s16, %s607_s16   ;;  %s500_s15 = sphi %s536_s15, %s606_s15  }
   0x3   : > { %s18_s20 = ssub.s32 %s508_s17, %s555_s19  ;;  %s21_s21 = sadd.s32 1, %s504_s16 }
   0x4   : > { %p19_p0 = scmp.eq.s32.totalorder %s18_s20, 0  ;;  %p28_p1 = scmp.ne.s32.totalorder %s504_s16, %s500_s15 }
   0x5   : > { %p29_p2 = scmp.eq.s32.totalorder %s508_s17, 0  ;;  %p443_p4 = scmp.ge.s32.totalorder %s508_s17, 2 }
   0x6   : > { %s564_s22 = scalar_select %p19_p0, %s504_s16, %s21_s21  }
   0x7   : > { %p30_p3 = por %p29_p2, %p28_p1  ;;  %158 = sbr.rel (%p443_p4) target bundleno = 20 (0x14), region = 16 }
   0xc   : > { %161 = sbr.rel (!%p30_p3) target bundleno = 20 (0x14), region = 20  ;;  %s163_s23 = sand.u32 (%p30_p3), 1, %s504_s16  }
   0xd   : > { %s445_s24 = sshll.u32 (%p30_p3), %s508_s17, 3  ;;  %s444_s25 = sshll.u32 (%p30_p3), %s163_s23, 5 }
   0xe   : > { %s167_s28 = scalar_lea.vmem (%p30_p3), %s601_s0, %s445_s24  ;;  %s165_s29 = scalar_lea.vmem (%p30_p3), [#allocation2], %s444_s25 }
   0xf   : > { %v202_v0 = vld [vmem:[%s167_s28] sm:$0xff] (%p30_p3)  ;;  %v204_v1 = vld [vmem:[%s167_s28 + $0x10] sm:$0xff] (%p30_p3) }
  0x10   : > { %v206_v2 = vld [vmem:[%s167_s28 + $0x20] sm:$0xff] (%p30_p3)  ;;  %203 = vst [vmem:[%s165_s29] sm:$0xff] (%p30_p3), %v202_v0  ;;  %v208_v3 = vld [vmem:[%s167_s28 + $0x30] sm:$0xff] (%p30_p3) }
  0x11   : > { %205 = vst [vmem:[%s165_s29 + $0x8] sm:$0xff] %v204_v1 }
  0x12   : > { %207 = vst [vmem:[%s165_s29 + $0x10] sm:$0xff] %v206_v2 }
  0x13   : > { %209 = vst [vmem:[%s165_s29 + $0x18] sm:$0xff] %v208_v3 }
  0x14 PF: > { %p446_p5 = scmp.ge.s32.totalorder %s508_s17, 1  ;;  %p235_p6 = scmp.lt.s32.totalorder %s508_s17, 3 }
  0x16   : > { %p236_p7 = pnand %p446_p5, %p235_p6 }
  0x17   : > { %s242_s30 = sand.u32 (!%p236_p7), 1, %s500_s15   ;;  %p282_p8 = scmp.lt.s32.totalorder (!%p236_p7), %s552_s18, 1 }
  0x18   : > { %239 = sbr.rel (%p236_p7) target bundleno = 197 (0xc5), region = 70  ;;  %s447_s5 = sshll.u32 (!%p236_p7), %s242_s30, 5 }
  0x19   : > { %s244_s6 = scalar_lea.vmem (!%p236_p7), [#allocation2], %s447_s5  ;;  %p278_p9 = scmp.lt.s32.totalorder (!%p236_p7), %s552_s18, 3 }
  0x1d   : > { %v510_v4 = vmov 0   ;;  %v296_v5 = vld [vmem:[%s244_s6] sm:$0xff]  ;;  %v452_v6 = vld [vmem:[%s244_s6 + $0x8] sm:$0xff]  ;;  %v453_v7 = vld [vmem:[%s244_s6 + $0x10] sm:$0xff]  ;;  %s283_s7 = scalar_select %p282_p8, %s552_s18, 1 }
  0x1e   : > { %482 = vset.pattern.permute.xlu1 %v510_v4  ;;  %483 = vset.pattern.permute.xlu0 %v510_v4  ;;  %v299_v8 = vadd.f32 %v452_v6, %v296_v5  ;;  %v454_v9 = vld [vmem:[%s244_s6 + $0x18] sm:$0xff]  ;;  %s610_s18 = smov (!%p278_p9, %s552_s18), 3 }
  0x1f   : > { %s449_s8 = sshll.u32 %s283_s7, 3  ;;  %s448_s15 = sshll.u32 %s610_s18, 3 }
  0x20   : > { %v302_v10 = vadd.f32 %v453_v7, %v299_v8  ;;  %s285_s11 = scalar_lea.vmem %s603_s2, %s449_s8  ;;  %s289_s14 = scalar_lea.vmem %s604_s3, %s449_s8 }
  0x21   : > { %v294_v11 = vld [vmem:[%s285_s11] sm:$0xff]  ;;  %s281_s21 = scalar_lea.vmem %s602_s1, %s448_s15  ;;  %s293_s25 = scalar_lea.vmem %s605_s4, %s448_s15 }
  0x22   : > { %v305_v12 = vadd.f32 %v454_v9, %v302_v10  ;;  %331 = vperm.xlu1 %482, %v294_v11   ;;  %v295_v14 = vld [vmem:[%s289_s14] sm:$0xff] }
  0x23   : > { %v342_v36 = vld [vmem:[%s281_s21] sm:$0xff] }
  0x24   : > { %v306_v13 = vmul.f32 0.25, %v305_v12 }
  0x26   : > { %307 = vadd.xlane.f32.xlu0 %v306_v13  ;;  %v309_v15 = vmul.f32 %v306_v13, %v306_v13 }
  0x2a   : > { %337 = vperm.xlu1 %482, %v295_v14  }
  0x2e   : > { %310 = vadd.xlane.f32.xlu0 %v309_v15 }
  0x94   : > { %v332_v27 = vpop.permute.xlu1 %331 }
  0x99   : > { %v308_v16 = vpop.xlane.xlu0 %307 }
  0x9a   : > { %v312_v17 = vmul.f32 0.0078125, %v308_v16 }
  0x9c   : > { %v314_v19 = vmul.f32 %v312_v17, %v312_v17  ;;  %v316_v30 = vsub.f32 %v306_v13, %v312_v17  ;;  %v338_v34 = vpop.permute.xlu1 %337 }
  0xa1   : > { %v311_v18 = vpop.xlane.xlu0 %310 }
  0xa2   : > { %v313_v20 = vmul.f32 0.0078125, %v311_v18 }
  0xa4   : > { %v315_v21 = vsub.f32 %v313_v20, %v314_v19 }
  0xa6   : > { %v317_v22 = vadd.f32 1e-05, %v315_v21 }
  0xa8   : > { %484 = vrsqrt.f32 %v317_v22  ;;  %vm324_vm1 = vweird.f32 %v317_v22 }
  0xae   : > { %v485_v23 = vpop.eup %484 }
  0xaf   : > { %v319_v24 = vmul.f32 %v485_v23, %v317_v22  ;;  %vm325_vm0 = vweird.f32 %v485_v23 }
  0xb0   : > { %vm326_vm2 = vmor %vm324_vm1, %vm325_vm0 }
  0xb1   : > { %v320_v25 = vmul.f32 %v485_v23, %v319_v24 }
  0xb3   : > { %v321_v26 = vmul.f32 0.5, %v320_v25 }
  0xb5   : > { %v322_v28 = vsub.f32 1.5, %v321_v26 }
  0xb7   : > { %v323_v29 = vmul.f32 %v485_v23, %v322_v28 }
  0xb9   : > { %v327_v31 = vsel %vm326_vm2, %v485_v23, %v323_v29 }
  0xba   : > { %v328_v32 = vmul.f32 %v327_v31, %v316_v30 }
  0xbc   : > { %v334_v33 = vmul.f32 %v332_v27, %v328_v32 }
  0xbe   : > { %v340_v35 = vadd.f32 %v338_v34, %v334_v33 }
  0xc0   : > { %v341_v37 = vmax.f32 %v340_v35, 0.0 }
  0xc2   : > { %v343_v38 = vadd.f32 %v342_v36, %v341_v37 }
  0xc4   : > { %344 = vst [vmem:[%s293_s25] sm:$0xff] %v343_v38 }
  0xc5 PF: > { %p11_p10 = scmp.ge.s32.totalorder %s555_s19, 4   ;;  %s606_s15 = smov %s504_s16 }
  0xc6   : > { %s607_s16 = smov %s564_s22  ;;  %s608_s17 = smov %s555_s19 }
  0xc7   :  { %13 = sbr.rel (!%p11_p10) target bundleno = 2 (0x2), region = 121 }

</bundles_post_ra>
